<compile_context>
chip_gen: v7x
topology: tpu7x:2x2x1
jax: 0.10.0
libtpu: 0.0.40
codegen_flags: <defaults>
</compile_context>

<pallas_src>
import functools

import jax
import jax.numpy as jnp
from jax import lax
from jax.experimental import pallas as pl
from jax.experimental.pallas import tpu as pltpu

_SQRT1_2 = 0.7071067811865476


def _mlp_kernel(x_ref, w1_ref, w2_ref, o_ref, acc_ref):
    """One (row-tile, F-slab) step of fused c_fc -> GELU -> c_proj.

    x_ref:   (tm, E_pad)  activation row tile (same block across the F axis)
    w1_ref:  (E_pad, tf)  slab of padded c_fc.weight.T
    w2_ref:  (tf, E_pad)  slab of padded c_proj.weight.T
    o_ref:   (tm, E_pad)  output row tile (written on the last F step)
    acc_ref: (tm, E_pad)  f32 accumulator scratch
    """
    k = pl.program_id(1)

    # c_fc slab: MXU matmul in native operand dtype, f32 accumulation.
    h = jnp.dot(x_ref[...], w1_ref[...], preferred_element_type=jnp.float32)

    # Exact (erf-based) GELU, f32 epilogue — matches nn.GELU() default.
    h = 0.5 * h * (1.0 + lax.erf(h * jnp.float32(_SQRT1_2)))

    # c_proj slab: cast intermediate back to the weight dtype so the MXU runs at
    # full (e.g. bf16) rate; accumulate in f32.
    contrib = jnp.dot(h.astype(w2_ref.dtype), w2_ref[...],
                      preferred_element_type=jnp.float32)

    # First F-slab: plain store (saves a (tm, E) zero-fill + extra VMEM read).
    @pl.when(k == 0)
    def _():
        acc_ref[...] = contrib

    @pl.when(k > 0)
    def _():
        acc_ref[...] += contrib

    @pl.when(k == pl.num_programs(1) - 1)
    def _():
        # Dropout with p=0.0 (module default) in eval mode is the identity.
        # TODO(synk): training-mode dropout would need pltpu.prng_seed/prng_random_bits here.
        o_ref[...] = acc_ref[...].astype(o_ref.dtype)


# ----------------------------- host-side helpers -----------------------------

def _round_up(x, m):
    return (x + m - 1) // m * m


def _vmem_capacity_bytes():
    """Physical per-core VMEM (128 MiB on v5e/v6e, 64 MiB on v7x); safe fallback."""
    try:
        cap = int(pltpu.get_tpu_info().vmem_capacity_bytes)
        if cap > 0:
            return cap
    except Exception:
        pass
    return 64 * 2 ** 20  # conservative (v7x-sized) fallback


def _vmem_need_bytes(tm, tf, e_pad, itemsize):
    """Double-buffered x / W1 / W2 / out tiles + f32 acc + (tm, tf) f32 + recast."""
    dbuf = 2 * (tm * e_pad + e_pad * tf + tf * e_pad + tm * e_pad) * itemsize
    return dbuf + tm * e_pad * 4 + tm * tf * (4 + itemsize)


def _select_tiles(M, e_pad, f_pad, itemsize, vmem_budget):
    """Pick (tm, tf).  tm is prioritized (it is the only knob that cuts HBM weight
    traffic); tf shrinks first when VMEM is tight (e.g. v7x 64 MiB)."""
    sub = {4: 8, 2: 16, 1: 32}.get(itemsize, 8)          # dtype sublane multiple
    big_vmem = vmem_budget >= 80 * 2 ** 20                # v5e/v6e (128 MiB parts)
    tm_target = 1024 if big_vmem else 512

    if M >= tm_target:
        tm = tm_target
    elif M > sub:
        # Small M (decode): keep grid_m >= 2 so both v7x TensorCores get work.
        tm = _round_up(-(-M // 2), sub)
    else:
        tm = sub

    tf_cands = [t for t in (1024, 512, 256, 128) if t <= f_pad and f_pad % t == 0]
    if f_pad <= 1024 and f_pad not in tf_cands:
        tf_cands.append(f_pad)
    tf_cands = sorted(set(tf_cands), reverse=True)
    if not big_vmem:
        # v7x: cap the slab width at 512 and spend the freed VMEM on tm.
        capped = [t for t in tf_cands if t <= 512]
        tf_cands = capped if capped else tf_cands

    while True:
        for tf in tf_cands:
            if _vmem_need_bytes(tm, tf, e_pad, itemsize) <= vmem_budget:
                return tm, tf
        if tm <= sub:
            return sub, tf_cands[-1]          # last resort; let Mosaic cope
        tm = max(sub, _round_up(tm // 2, sub))


def prepare_mlp_params(w_fc, w_proj):
    """One-time (init) weight prep — do NOT call per forward.

    w_fc:   (F, E) == c_fc.weight   (torch (out, in) layout)
    w_proj: (E, F) == c_proj.weight

    Returns (w1p, w2p) with shapes (E_pad, F_pad) and (F_pad, E_pad):
    E padded to a multiple of 128 (lane-dense stores), F padded to a multiple of
    512 (>= 512) or 128.  Zero padding does not change the math: padded W1 columns
    give GELU(0) = 0 activations and padded W2 rows are zero.
    """
    F, E = w_fc.shape
    e_pad = _round_up(E, 128)
    f_pad = _round_up(F, 512 if F >= 512 else 128)
    w1 = w_fc.T    # (E, F)
    w2 = w_proj.T  # (F, E)
    if e_pad != E or f_pad != F:
        w1 = jnp.pad(w1, ((0, e_pad - E), (0, f_pad - F)))
        w2 = jnp.pad(w2, ((0, f_pad - F), (0, e_pad - E)))
    return w1, w2


# --------------------------------- forward -----------------------------------

@jax.jit
def mlp_forward(x, w1p, w2p):
    """Fused MLP forward: gelu(x @ W1) @ W2 (bias=False, dropout p=0 per module defaults).

    x:    (..., E)        activations (E = original n_embd)
    w1p:  (E_pad, F_pad)  from prepare_mlp_params
    w2p:  (F_pad, E_pad)  from prepare_mlp_params
    """
    orig_shape = x.shape
    E = orig_shape[-1]
    M = 1
    for d in orig_shape[:-1]:
        M *= d
    e_pad, f_pad = w1p.shape
    itemsize = jnp.dtype(x.dtype).itemsize

    # Per-generation VMEM budgeting (static, at trace time).
    vmem_physical = _vmem_capacity_bytes()
    vmem_budget = int(vmem_physical * 0.80)            # tile-selection budget

    tm, tf = _select_tiles(M, e_pad, f_pad, itemsize, vmem_budget)
    M_pad = _round_up(M, tm)

    x2 = x.reshape(M, E)
    if M_pad != M or e_pad != E:                       # pad only when needed
        x2 = jnp.pad(x2, ((0, M_pad - M), (0, e_pad - E)))

    grid = (M_pad // tm, f_pad // tf)

    need = _vmem_need_bytes(tm, tf, e_pad, itemsize)
    # Leave headroom below physical VMEM (compiler scratch, GELU intermediate).
    vmem_limit = int(min(vmem_physical * 0.90,
                         max(need + (need >> 2), 32 * 2 ** 20)))

    w_itemsize = jnp.dtype(w1p.dtype).itemsize
    w_bytes = (int(w1p.size) + int(w2p.size)) * w_itemsize
    cost = pl.CostEstimate(
        flops=4 * M_pad * e_pad * f_pad,               # two matmuls
        transcendentals=M_pad * f_pad,                 # erf
        # Weights are re-streamed once per row tile (grid_m times).
        bytes_accessed=grid[0] * w_bytes + 2 * M_pad * e_pad * itemsize,
    )

    out = pl.pallas_call(
        _mlp_kernel,
        out_shape=jax.ShapeDtypeStruct((M_pad, e_pad), x.dtype),
        grid=grid,
        in_specs=[
            pl.BlockSpec((tm, e_pad), lambda i, k: (i, 0)),   # activation rows
            pl.BlockSpec((e_pad, tf), lambda i, k: (0, k)),   # c_fc weight slab
            pl.BlockSpec((tf, e_pad), lambda i, k: (k, 0)),   # c_proj weight slab
        ],
        out_specs=pl.BlockSpec((tm, e_pad), lambda i, k: (i, 0)),
        scratch_shapes=[pltpu.VMEM((tm, e_pad), jnp.float32)],
        compiler_params=pltpu.CompilerParams(
            dimension_semantics=("parallel", "arbitrary"),
            vmem_limit_bytes=vmem_limit,
        ),
        cost_estimate=cost,
    )(x2, w1p, w2p)

    if M_pad != M or e_pad != E:
        out = out[:M, :E]
    return out.reshape(orig_shape)


def _gelu_exact(x):
    return 0.5 * x * (1.0 + lax.erf(x * 0.7071067811865476))


if __name__ == "__main__":
    # Small shapes consistent with the module: batch=2, seq=8, n_embd=32, ff=128.
    B, S, E, F = 2, 8, 32, 128

    key = jax.random.PRNGKey(0)
    kx, k1, k2 = jax.random.split(key, 3)

    x = jax.random.normal(kx, (B, S, E), dtype=jnp.float32)

    # Deterministic param init mimicking torch.nn.Linear (bias=False per module default):
    # uniform(-1/sqrt(fan_in), 1/sqrt(fan_in)).
    b1 = 1.0 / jnp.sqrt(jnp.float32(E))
    b2 = 1.0 / jnp.sqrt(jnp.float32(F))
    w_fc = jax.random.uniform(k1, (F, E), minval=-b1, maxval=b1, dtype=jnp.float32)    # (out, in)
    w_proj = jax.random.uniform(k2, (E, F), minval=-b2, maxval=b2, dtype=jnp.float32)  # (out, in)

    # One-time weight preparation (padding/transposition kept out of the hot path).
    w1p, w2p = prepare_mlp_params(w_fc, w_proj)

    y = jax.block_until_ready(mlp_forward(x, w1p, w2p))

    # Pure-JAX reference (same semantics as the PyTorch forward in eval mode).
    ref = _gelu_exact(x @ w_fc.T) @ w_proj.T
    assert y.shape == (B, S, E)
    assert jnp.allclose(y, ref, atol=1e-5, rtol=1e-5), "mismatch vs reference"

    print("KERNEL_OK")
</pallas_src>

<mosaic_0001>
module attributes {stable_mosaic.version = 11 : i64} {
  func.func @_mlp_kernel(%arg0: i32, %arg1: i32, %arg2: memref<8x128xf32, #tpu.memory_space<vmem>>, %arg3: memref<128x128xf32, #tpu.memory_space<vmem>>, %arg4: memref<128x128xf32, #tpu.memory_space<vmem>>, %arg5: memref<8x128xf32, #tpu.memory_space<vmem>>, %arg6: memref<8x128xf32, #tpu.memory_space<vmem>>) attributes {dimension_semantics = [#tpu.dimension_semantics<parallel>, #tpu.dimension_semantics<arbitrary>], iteration_bounds = array<i64: 2, 1>, scalar_prefetch = 0 : i64, scratch_operands = 1 : i64, tpu.core_type = #tpu.core_type<tc>, window_params = [{transform_indices = @transform_0, window_bounds = array<i64: 8, 128>}, {transform_indices = @transform_1, window_bounds = array<i64: 128, 128>}, {transform_indices = @transform_2, window_bounds = array<i64: 128, 128>}, {transform_indices = @transform_3, window_bounds = array<i64: 8, 128>}]} {
    %c0 = arith.constant 0 : index
    %c0_0 = arith.constant 0 : index
    %0 = vector.load %arg2[%c0, %c0_0] : memref<8x128xf32, #tpu.memory_space<vmem>>, vector<8x128xf32>
    %c0_1 = arith.constant 0 : index
    %c0_2 = arith.constant 0 : index
    %1 = vector.load %arg3[%c0_1, %c0_2] : memref<128x128xf32, #tpu.memory_space<vmem>>, vector<128x128xf32>
    %cst = arith.constant dense<0.000000e+00> : vector<8x128xf32>
    %2 = tpu.matmul %0, %1, %cst {dimension_numbers = #tpu.dot_dimension_numbers<[1], [0], [0], [1], [0, 0, 1, 1], [], []>} : vector<8x128xf32>, vector<128x128xf32>, vector<8x128xf32> -> vector<8x128xf32>
    %cst_3 = arith.constant 5.000000e-01 : f32
    %3 = vector.broadcast %cst_3 : f32 to vector<8x128xf32>
    %4 = arith.mulf %3, %2 : vector<8x128xf32>
    %cst_4 = arith.constant 0.707106769 : f32
    %5 = vector.broadcast %cst_4 : f32 to vector<8x128xf32>
    %6 = arith.mulf %2, %5 : vector<8x128xf32>
    %7 = math.erf %6 : vector<8x128xf32>
    %cst_5 = arith.constant 1.000000e+00 : f32
    %8 = vector.broadcast %cst_5 : f32 to vector<8x128xf32>
    %9 = arith.addf %8, %7 : vector<8x128xf32>
    %10 = arith.mulf %4, %9 : vector<8x128xf32>
    %c0_6 = arith.constant 0 : index
    %c0_7 = arith.constant 0 : index
    %11 = vector.load %arg4[%c0_6, %c0_7] : memref<128x128xf32, #tpu.memory_space<vmem>>, vector<128x128xf32>
    %cst_8 = arith.constant dense<0.000000e+00> : vector<8x128xf32>
    %12 = tpu.matmul %10, %11, %cst_8 {dimension_numbers = #tpu.dot_dimension_numbers<[1], [0], [0], [1], [0, 0, 1, 1], [], []>} : vector<8x128xf32>, vector<128x128xf32>, vector<8x128xf32> -> vector<8x128xf32>
    %c0_i32 = arith.constant 0 : i32
    %13 = arith.cmpi eq, %arg1, %c0_i32 : i32
    %14 = arith.extui %13 : i1 to i32
    %c0_i32_9 = arith.constant 0 : i32
    %15 = arith.cmpi ne, %14, %c0_i32_9 : i32
    scf.if %15 {
      %c0_14 = arith.constant 0 : index
      %c0_15 = arith.constant 0 : index
      %22 = vector.load %arg6[%c0_14, %c0_15] : memref<8x128xf32, #tpu.memory_space<vmem>>, vector<8x128xf32>
      tpu.vector_store %arg6[%c0_14, %c0_15], %12 {strides = array<i32>} : memref<8x128xf32, #tpu.memory_space<vmem>>, vector<8x128xf32>,
    } else {
    }
    %c0_i32_10 = arith.constant 0 : i32
    %16 = arith.cmpi sgt, %arg1, %c0_i32_10 : i32
    %17 = arith.extui %16 : i1 to i32
    %c0_i32_11 = arith.constant 0 : i32
    %18 = arith.cmpi ne, %17, %c0_i32_11 : i32
    scf.if %18 {
      %c0_14 = arith.constant 0 : index
      %c0_15 = arith.constant 0 : index
      %22 = vector.load %arg6[%c0_14, %c0_15] : memref<8x128xf32, #tpu.memory_space<vmem>>, vector<8x128xf32>
      %23 = arith.addf %22, %12 : vector<8x128xf32>
      %c0_16 = arith.constant 0 : index
      %c0_17 = arith.constant 0 : index
      %24 = vector.load %arg6[%c0_16, %c0_17] : memref<8x128xf32, #tpu.memory_space<vmem>>, vector<8x128xf32>
      tpu.vector_store %arg6[%c0_16, %c0_17], %23 {strides = array<i32>} : memref<8x128xf32, #tpu.memory_space<vmem>>, vector<8x128xf32>,
    } else {
    }
    %c0_i32_12 = arith.constant 0 : i32
    %19 = arith.cmpi eq, %arg1, %c0_i32_12 : i32
    %20 = arith.extui %19 : i1 to i32
    %c0_i32_13 = arith.constant 0 : i32
    %21 = arith.cmpi ne, %20, %c0_i32_13 : i32
    scf.if %21 {
      %c0_14 = arith.constant 0 : index
      %c0_15 = arith.constant 0 : index
      %22 = vector.load %arg6[%c0_14, %c0_15] : memref<8x128xf32, #tpu.memory_space<vmem>>, vector<8x128xf32>
      %c0_16 = arith.constant 0 : index
      %c0_17 = arith.constant 0 : index
      %23 = vector.load %arg5[%c0_16, %c0_17] : memref<8x128xf32, #tpu.memory_space<vmem>>, vector<8x128xf32>
      tpu.vector_store %arg5[%c0_16, %c0_17], %22 {strides = array<i32>} : memref<8x128xf32, #tpu.memory_space<vmem>>, vector<8x128xf32>,
    } else {
    }
    return
  }
  func.func @transform_0(%arg0: i32, %arg1: i32) -> (i32, i32) {
    %c0_i32 = arith.constant 0 : i32
    %c0_i32_0 = arith.constant 0 : i32
    return %arg0, %c0_i32 : i32, i32
  }
  func.func @transform_1(%arg0: i32, %arg1: i32) -> (i32, i32) {
    %c0_i32 = arith.constant 0 : i32
    %c0_i32_0 = arith.constant 0 : i32
    return %c0_i32, %arg1 : i32, i32
  }
  func.func @transform_2(%arg0: i32, %arg1: i32) -> (i32, i32) {
    %c0_i32 = arith.constant 0 : i32
    %c0_i32_0 = arith.constant 0 : i32
    return %arg1, %c0_i32 : i32, i32
  }
  func.func @transform_3(%arg0: i32, %arg1: i32) -> (i32, i32) {
    %c0_i32 = arith.constant 0 : i32
    %c0_i32_0 = arith.constant 0 : i32
    return %arg0, %c0_i32 : i32, i32
  }
}

</mosaic_0001>

<bundles_post_ra>
// kernel: mlp_forward.1
= control target key start
LH: loop header
LB: loop body
LE: loop exit
PB: predicated region body
PF: predicated region fallthrough
CT: control target
= control target key end

     0   :  { %8 = vsyncpa [#allocation4], 0  ;;  %s975_s0 = inlined_call_operand.vmem [shape: f32[16,128], index: 0, kind: input, shape index: {}]   ;;  %s976_s1 = inlined_call_operand.hbm [shape: f32[128,128], index: 1, kind: input, shape index: {}]   ;;  %s977_s2 = inlined_call_operand.hbm [shape: f32[128,128], index: 2, kind: input, shape index: {}]   ;;  %s978_s3 = inlined_call_operand.vmem [shape: f32[16,128], index: 3, kind: output, shape index: {}]  }
   0x1   :  { %9 = vsyncpa [#allocation6], 0  ;;  %s839_s12 = smov 0   ;;  %s841_s13 = smov 0  }
   0x2   :  { %s843_s14 = smov 0  }
   0x3 LB: > { %s507_s15 = sadd.s32 4294967295, %s810_s14   ;;  %s27_s16 = sadd.s32 1, %s806_s13  ;;  %s810_s14 = sphi %s843_s14, %s15_s14   ;;  %s806_s13 = sphi %s841_s13, %s988_s13   ;;  %s802_s12 = sphi %s839_s12, %s987_s12  }
   0x4   : > { %p29_p0 = scmp.ge.s32.totalorder %s27_s16, 2  ;;  %p509_p1 = scmp.ge.s32.totalorder %s810_s14, 1 }
   0x5   : > { %p136_p2 = scmp.lt.s32.totalorder %s810_s14, 3  ;;  %p864_p4 = scmp.eq.s32.totalorder %s507_s15, 0 }
   0x6   : > { %s990_s16 = smov (%p29_p0, %s27_s16), 0  ;;  %s812_s19 = smov [#allocation3]  }
   0x7   : > { %p860_p3 = pnand %p509_p1, %p136_p2  ;;  %s150_s20 = sshll.u32 %s812_s19, 4  ;;  %s151_s20 = int_to_ptr.vmem [resolvable:$true] %s150_s20 }
   0x8   : > { %s983_s18 = scalar_select %p864_p4, 1, 0 }
   0x9   : > { %s982_s17 = scalar_select %p860_p3, 1, 0 }
   0xa   : > { %p680_p5 = pneg %p860_p3  ;;  %s813_s22 = smov [#allocation5]  }
   0xb   : > { %s166_s23 = sshll.u32 %s813_s22, 4  ;;  %s724_s26 = scalar_lea.hbm %s976_s1, 2048  ;;  %s876_s23 = int_to_ptr.vmem [resolvable:$true] %s166_s23 }
   0xc   : > { %p872_p6 = pnand %p864_p4, %p680_p5  ;;  %p725_p7 = scmp.ne.s32.totalorder %s976_s1, %s724_s26 }
   0xd   : > { %p731_p11 = scmp.lt.u32.totalorder %s724_s26, %s976_s1 }
   0xe   : > { %p726_p8 = pneg %p872_p6 }
  0x10   : > { %p727_p9 = pnand %p726_p8, %p725_p7 }
  0x12   : > { %p728_p10 = pneg %p727_p9 }
  0x14   : > { %p733_p12 = pnand %p731_p11, %p728_p10 }
  0x16   : > { %736 = shalt.err (!%p733_p12)
}
  0x17   : > { %s737_s4 = scalar_lea.vmem %s151_s20, 2048  ;;  %p745_p2 = scmp.lt.s32.totalorder %s151_s20, %s151_s20 }
  0x18   : > { %p738_p13 = scmp.ne.s32.totalorder %s151_s20, %s737_s4  ;;  %p746_p5 = scmp.lt.s32.totalorder %s737_s4, %s737_s4 }
  0x1a   : > { %p740_p0 = pnand %p738_p13, %p726_p8  ;;  %p747_p4 = por %p746_p5, %p745_p2 }
  0x1c   : > { %p741_p1 = pneg %p740_p0 }
  0x1e   : > { %p748_p3 = pnand %p747_p4, %p741_p1 }
  0x20   : > { %751 = shalt.err (!%p748_p3)
}
  0x21   : > { %s814_s5 = smov 128   ;;  %s815_s6 = smov 8  }
  0x22   : > { %683 = dma.hbm_to_vmem [thread:$0]  (!%p872_p6), %s976_s1, 2048, %s151_s20, [#allocation4], %s814_s5, %s814_s5, %s815_s6  }
  0x23   : > { %s752_s11 = scalar_lea.hbm %s977_s2, 2048 }
  0x24   : > { %p753_p7 = scmp.ne.s32.totalorder %s977_s2, %s752_s11  ;;  %p759_p9 = scmp.lt.u32.totalorder %s752_s11, %s977_s2 }
  0x26   : > { %p755_p3 = pnand %p753_p7, %p726_p8 }
  0x28   : > { %p756_p4 = pneg %p755_p3 }
  0x2a   : > { %p761_p10 = pnand %p759_p9, %p756_p4 }
  0x2c   : > { %764 = shalt.err (!%p761_p10)
}
  0x2d   : > { %s765_s20 = scalar_lea.vmem %s876_s23, 2048  ;;  %p773_p0 = scmp.lt.s32.totalorder %s876_s23, %s876_s23 }
  0x2e   : > { %p766_p11 = scmp.ne.s32.totalorder %s876_s23, %s765_s20  ;;  %p774_p1 = scmp.lt.s32.totalorder %s765_s20, %s765_s20 }
  0x30   : > { %p768_p12 = pnand %p766_p11, %p726_p8  ;;  %p775_p2 = por %p774_p1, %p773_p0 }
  0x32   : > { %p769_p13 = pneg %p768_p12 }
  0x34   : > { %p776_p5 = pnand %p775_p2, %p769_p13 }
  0x36   : > { %779 = shalt.err (!%p776_p5)
}
  0x37   : > { %686 = dma.hbm_to_vmem [thread:$0]  (!%p872_p6), %s977_s2, 2048, %s876_s23, [#allocation6], %s814_s5, %s814_s5, %s815_s6  }
  0x38   : > { %p985_p7 = scmp.ne.s32.totalorder %s982_s17, 0 }
  0x39   : > { %p986_p3 = scmp.ne.s32.totalorder (!%p985_p7), %s983_s18, 0 }
  0x3a   : > { %189 = sbr.rel (%p985_p7) target bundleno = 545 (0x221), region = 32 }
  0x41   : > { %793 = dma.done.wait (%p986_p3), [#allocation4], 2048  }
  0x42   : > { %795 = vsyncadd (%p986_p3), [#allocation4], 4294965248 }
  0x43   : > { %797 = dma.done.wait (%p986_p3), [#allocation6], 2048  }
  0x44   : > { %799 = vsyncadd (%p986_p3), [#allocation6], 4294965248  ;;  %v816_v0 = vmov 0.0|0.0   ;;  %vm817_vm0 = vmmov 0   ;;  %v818_v1 = vmov 0.0   ;;  %v225_v2 = vld [vmem:[#allocation3] sm:$0xff] }
  0x45   : > { %624 = vmatprep.subr.bf16.mxu0 %v816_v0  ;;  %586 = vmatprep.mubr.msk.f32.mxu0 %vm817_vm0, %v818_v1  ;;  %v226_v3 = vld [vmem:[#allocation3 + $0x8] sm:$0xff]  ;;  %v227_v4 = vld [vmem:[#allocation3 + $0x10] sm:$0xff]  ;;  %v228_v6 = vld [vmem:[#allocation3 + $0x18] sm:$0xff]  ;;  %p215_p6 = scmp.lt.s32.totalorder %s802_s12, 1 }
  0x46   : > { %648 = vmatprep.subr.bf16.mxu1 %v816_v0  ;;  %621 = vmatprep.mubr.msk.f32.mxu1 %vm817_vm0, %v818_v1  ;;  %v625_v5 = vpack.c.bf16 %v226_v3, %v225_v2  ;;  %v628_v7 = vpack.c.bf16 %v228_v6, %v227_v4  ;;  %v229_v8 = vld [vmem:[#allocation3 + $0x20] sm:$0xff]  ;;  %v230_v9 = vld [vmem:[#allocation3 + $0x28] sm:$0xff]  ;;  %v318_v12 = vld [vmem:[#allocation5 + $0x10] sm:$0xff] }
  0x47   : > { %v316_v10 = vld [vmem:[#allocation5] sm:$0xff]  ;;  %v317_v11 = vld [vmem:[#allocation5 + $0x8] sm:$0xff]  ;;  %v319_v13 = vld [vmem:[#allocation5 + $0x18] sm:$0xff]  ;;  %v631_v14 = vpack.c.bf16 %v230_v9, %v229_v8  ;;  %s992_s12 = smov (!%p215_p6, %s802_s12), 1 }
  0x48   : > { %626 = vmatpush3.bf16.msra.mxu0 %v625_v5  ;;  %v649_v15 = vpack.c.bf16 %v317_v11, %v316_v10  ;;  %v231_v16 = vld [vmem:[#allocation3 + $0x30] sm:$0xff]  ;;  %v232_v17 = vld [vmem:[#allocation3 + $0x38] sm:$0xff]  ;;  %v652_v18 = vpack.c.bf16 %v319_v13, %v318_v12  ;;  %v320_v19 = vld [vmem:[#allocation5 + $0x20] sm:$0xff]  ;;  %s516_s17 = sshll.u32 %s992_s12, 3 }
  0x49   : > { %627 = vmatprep.subr.bf16.mxu0 %v816_v0  ;;  %v321_v20 = vld [vmem:[#allocation5 + $0x28] sm:$0xff]  ;;  %v634_v21 = vpack.c.bf16 %v232_v17, %v231_v16  ;;  %v233_v22 = vld [vmem:[#allocation3 + $0x40] sm:$0xff]  ;;  %v322_v25 = vld [vmem:[#allocation5 + $0x30] sm:$0xff]  ;;  %s218_s23 = scalar_lea.vmem %s975_s0, %s516_s17  ;;  %s223_s29 = scalar_lea.vmem %s978_s3, %s516_s17 }
  0x4a   : > { %650 = vmatpush3.bf16.msra.mxu1 %v649_v15  ;;  %v234_v23 = vld [vmem:[#allocation3 + $0x48] sm:$0xff]  ;;  %v655_v24 = vpack.c.bf16 %v321_v20, %v320_v19  ;;  %v323_v26 = vld [vmem:[#allocation5 + $0x38] sm:$0xff]  ;;  %v235_v28 = vld [vmem:[#allocation3 + $0x50] sm:$0xff] }
  0x4b   : > { %651 = vmatprep.subr.bf16.mxu1 %v816_v0  ;;  %v637_v27 = vpack.c.bf16 %v234_v23, %v233_v22  ;;  %v236_v29 = vld [vmem:[#allocation3 + $0x58] sm:$0xff]  ;;  %v658_v30 = vpack.c.bf16 %v323_v26, %v322_v25  ;;  %v237_v32 = vld [vmem:[#allocation3 + $0x60] sm:$0xff]  ;;  %v238_v33 = vld [vmem:[#allocation3 + $0x68] sm:$0xff] }
  0x4c   : > { %629 = vmatpush3.bf16.msra.mxu0 %v628_v7  ;;  %v640_v31 = vpack.c.bf16 %v236_v29, %v235_v28  ;;  %v643_v34 = vpack.c.bf16 %v238_v33, %v237_v32  ;;  %v239_v35 = vld [vmem:[#allocation3 + $0x70] sm:$0xff]  ;;  %v240_v36 = vld [vmem:[#allocation3 + $0x78] sm:$0xff]  ;;  %v224_v38 = vld [vmem:[%s218_s23] sm:$0xff] }
  0x4d   : > { %630 = vmatprep.subr.bf16.mxu0 %v816_v0  ;;  %v646_v37 = vpack.c.bf16 %v240_v36, %v239_v35  ;;  %v324_v39 = vld [vmem:[#allocation5 + $0x40] sm:$0xff]  ;;  %v325_v40 = vld [vmem:[#allocation5 + $0x48] sm:$0xff]  ;;  %v326_v42 = vld [vmem:[#allocation5 + $0x50] sm:$0xff] }
  0x4e   : > { %653 = vmatpush3.bf16.msra.mxu1 %v652_v18  ;;  %v661_v41 = vpack.c.bf16 %v325_v40, %v324_v39  ;;  %v327_v43 = vld [vmem:[#allocation5 + $0x58] sm:$0xff]  ;;  %v328_v45 = vld [vmem:[#allocation5 + $0x60] sm:$0xff]  ;;  %v329_v46 = vld [vmem:[#allocation5 + $0x68] sm:$0xff] }
  0x4f   : > { %654 = vmatprep.subr.bf16.mxu1 %v816_v0  ;;  %v664_v44 = vpack.c.bf16 %v327_v43, %v326_v42  ;;  %v667_v47 = vpack.c.bf16 %v329_v46, %v328_v45  ;;  %v330_v48 = vld [vmem:[#allocation5 + $0x70] sm:$0xff]  ;;  %v331_v49 = vld [vmem:[#allocation5 + $0x78] sm:$0xff] }
  0x50   : > { %632 = vmatpush3.bf16.msra.mxu0 %v631_v14  ;;  %v670_v50 = vpack.c.bf16 %v331_v49, %v330_v48 }
  0x51   : > { %633 = vmatprep.subr.bf16.mxu0 %v816_v0 }
  0x52   : > { %656 = vmatpush3.bf16.msra.mxu1 %v655_v24 }
  0x53   : > { %657 = vmatprep.subr.bf16.mxu1 %v816_v0 }
  0x54   : > { %635 = vmatpush3.bf16.msra.mxu0 %v634_v21 }
  0x55   : > { %636 = vmatprep.subr.bf16.mxu0 %v816_v0 }
  0x56   : > { %659 = vmatpush3.bf16.msra.mxu1 %v658_v30 }
  0x57   : > { %660 = vmatprep.subr.bf16.mxu1 %v816_v0 }
  0x58   : > { %638 = vmatpush3.bf16.msra.mxu0 %v637_v27 }
  0x59   : > { %639 = vmatprep.subr.bf16.mxu0 %v816_v0 }
  0x5a   : > { %662 = vmatpush3.bf16.msra.mxu1 %v661_v41 }
  0x5b   : > { %663 = vmatprep.subr.bf16.mxu1 %v816_v0 }
  0x5c   : > { %641 = vmatpush3.bf16.msra.mxu0 %v640_v31 }
  0x5d   : > { %642 = vmatprep.subr.bf16.mxu0 %v816_v0 }
  0x5e   : > { %665 = vmatpush3.bf16.msra.mxu1 %v664_v44 }
  0x5f   : > { %666 = vmatprep.subr.bf16.mxu1 %v816_v0 }
  0x60   : > { %644 = vmatpush3.bf16.msra.mxu0 %v643_v34 }
  0x61   : > { %645 = vmatprep.subr.bf16.mxu0 %v816_v0 }
  0x62   : > { %668 = vmatpush3.bf16.msra.mxu1 %v667_v47 }
  0x63   : > { %669 = vmatprep.subr.bf16.mxu1 %v816_v0 }
  0x64   : > { %647 = vmatpush3.bf16.msra.mxu0 %v646_v37 }
  0x66   : > { %671 = vmatpush3.bf16.msra.mxu1 %v670_v50 }
  0x67   : > { %587 = vmatmul.mubr.f32.vlgmr.msra.gmra.mrb[0].mxu0 %v224_v38 }
 0x13a   : > { %v307_v51 = vpop.f32.mrb[0].mxu0 }
 0x13b   : > { %v312_v52 = vmul.f32 0.70710677, %v307_v51  ;;  %v588_v53 = vpop.f32.mrb[1].mxu0  ;;  %v311_v55 = vmul.f32 0.5, %v307_v51 }
 0x13d   : > { %722 = verf.f32 %v312_v52 }
 0x147   : > { %v723_v54 = vpop.eup %722 }
 0x148   : > { %v314_v56 = vadd.f32 1.0, %v723_v54 }
 0x14a   : > { %v315_v57 = vmul.f32 %v314_v56, %v311_v55 }
 0x14c   : > { %622 = vmatmul.mubr.f32.vlgmr.msra.gmra.mrb[0].mxu1 %v315_v57 }
 0x21f   : > { %v398_v58 = vpop.f32.mrb[0].mxu1 }
 0x220   : > { %418 = vst [vmem:[%s223_s29] sm:$0xff] %v398_v58  ;;  %v623_v59 = vpop.f32.mrb[1].mxu1 }
 0x221 PF: > { %s15_s14 = sadd.s32 1, %s810_s14   ;;  %s987_s12 = smov %s806_s13 }
 0x222   : > { %p12_p8 = scmp.ge.s32.totalorder %s15_s14, 4   ;;  %s988_s13 = smov %s990_s16 }
 0x224   :  { %14 = sbr.rel (!%p12_p8) target bundleno = 3 (0x3), region = 85 }
 0x22b   :  { %438 = vsyncpa [#allocation4], 1 }
 0x22c   :  { %440 = vsyncpa [#allocation4 + $0x1], 1 }
 0x22d   :  { %441 = vsyncpa [#allocation6], 1 }

</bundles_post_ra>
